<compile_context>
chip_gen: v7x
topology: tpu7x:2x2x1
jax: 0.10.0
libtpu: 0.0.40
codegen_flags: <defaults>
</compile_context>

<pallas_src>
import jax
import jax.numpy as jnp
from jax.experimental import pallas as pl
from jax.experimental.pallas import tpu as pltpu

ENCODER_DEPTH = 4


def _round_up(n, m):
    return pl.cdiv(n, m) * m


def _make_kernel(depth):
    """Kernel over one batch tile: encoder MLP + fused [H, 2*Dp] sigmoid head."""
    def kernel(*refs):
        x_ref = refs[0]
        enc = refs[1:1 + 2 * depth]                 # w0, b0, w1, b1, ...
        wh_ref = refs[1 + 2 * depth]
        bh_ref = refs[2 + 2 * depth]
        mask_ref = refs[3 + 2 * depth]
        feat_ref = refs[4 + 2 * depth]

        h = x_ref[...]
        for layer in range(depth):
            w_ref = enc[2 * layer]
            b_ref = enc[2 * layer + 1]
            # bf16 (or f32) operands, f32 accumulation on the MXU.
            h = jnp.dot(h, w_ref[...], preferred_element_type=jnp.float32) + b_ref[...]
            h = jnp.maximum(h, 0.0).astype(w_ref.dtype)
            # TODO(synk): nn.Dropout(p=0.04) is identity in eval mode; training-mode dropout
            # would need pltpu.prng_seed / prng_random_bits + inverted scaling.

        # Fused mask/feature head: one MXU push, lane-aligned split into the two outputs.
        logits = jnp.dot(h, wh_ref[...], preferred_element_type=jnp.float32) + bh_ref[...]
        s = jax.nn.sigmoid(logits)
        dp = mask_ref.shape[-1]                     # multiple of 128 -> aligned slices
        mask_ref[...] = s[:, :dp].astype(mask_ref.dtype)
        feat_ref[...] = s[:, dp:].astype(feat_ref.dtype)
    return kernel


def prepare_params(params, compute_dtype=jnp.bfloat16):
    """One-time parameter preprocessing (hoisted out of the per-call wrapper).

    Pads D/H to lane-dense multiples of 128, fuses + pads the two heads, and casts
    weights to compute_dtype (biases stay f32).  Weights are [in, out].
    """
    enc_w, enc_b = params["enc_w"], params["enc_b"]
    D = enc_w[0].shape[0]
    H = enc_w[0].shape[1]
    Dp_in = _round_up(D, 128)     # padded K dim of layer 0 (and of x)
    Hp = _round_up(H, 128)        # padded hidden dim
    Dp_out = _round_up(D, 128)    # padded per-head output dim

    flat = []
    in_p = Dp_in
    for w, b in zip(enc_w, enc_b):
        w = jnp.pad(w, ((0, in_p - w.shape[0]), (0, Hp - w.shape[1]))).astype(compute_dtype)
        b = jnp.pad(b, ((0, 0), (0, Hp - b.shape[1]))).astype(jnp.float32)
        flat += [w, b]
        in_p = Hp

    def pad_head(w, b):
        w = jnp.pad(w, ((0, Hp - w.shape[0]), (0, Dp_out - w.shape[1])))
        b = jnp.pad(b, ((0, 0), (0, Dp_out - b.shape[1])))
        return w, b

    mw, mb = pad_head(params["mask_w"], params["mask_b"])
    fw, fb = pad_head(params["feat_w"], params["feat_b"])
    w_head = jnp.concatenate([mw, fw], axis=1).astype(compute_dtype)   # [Hp, 2*Dp_out]
    b_head = jnp.concatenate([mb, fb], axis=1).astype(jnp.float32)     # [1,  2*Dp_out]
    flat += [w_head, b_head]

    return dict(flat=tuple(flat), input_dim=D, padded_input_dim=Dp_in,
                out_cols=Dp_out, depth=len(enc_w), compute_dtype=compute_dtype)


def vime_self_forward(x, prep, *, tb=512, vmem_limit_bytes=32 * 1024 * 1024):
    """VIME self-supervised forward pass. Returns (mask, feature), each [B, D] float32."""
    B, D = x.shape
    assert D == prep["input_dim"]
    cdt = prep["compute_dtype"]
    Dp_in = prep["padded_input_dim"]
    Dp = prep["out_cols"]
    depth = prep["depth"]
    flat = prep["flat"]

    # ---- Batch tile selection: sublane-aligned, >= 2 grid steps for mid/large batches. ----
    sub = 16 if jnp.dtype(cdt).itemsize < 4 else 8
    Bp = max(sub, _round_up(B, sub))
    if Bp > 64:
        # Force at least 2 grid steps so both v7x TensorCores get work.
        tb = min(tb, _round_up(pl.cdiv(Bp, 2), sub))
    tb = max(sub, min(tb, Bp))
    Bp = _round_up(Bp, tb)

    # ---- Pad + cast the input stream (bf16 halves x DMA bytes on v6e/v7x). ----
    x = x.astype(cdt)
    if (Bp, Dp_in) != (B, D):
        x = jnp.pad(x, ((0, Bp - B), (0, Dp_in - D)))

    # x / outputs tiled over batch; params are small constant-index full blocks.
    in_specs = [pl.BlockSpec((tb, Dp_in), lambda i: (i, 0))]
    for p in flat:
        in_specs.append(pl.BlockSpec(p.shape, lambda i: (0, 0)))
    out_specs = [pl.BlockSpec((tb, Dp), lambda i: (i, 0)),
                 pl.BlockSpec((tb, Dp), lambda i: (i, 0))]

    fn = pl.pallas_call(
        _make_kernel(depth),
        out_shape=(jax.ShapeDtypeStruct((Bp, Dp), jnp.float32),
                   jax.ShapeDtypeStruct((Bp, Dp), jnp.float32)),
        grid_spec=pltpu.PrefetchScalarGridSpec(
            num_scalar_prefetch=0,
            grid=(Bp // tb,),
            in_specs=in_specs,
            out_specs=out_specs,
        ),
        compiler_params=pltpu.CompilerParams(
            dimension_semantics=("parallel",),
            vmem_limit_bytes=vmem_limit_bytes),
    )
    mask_p, feat_p = fn(x, *flat)

    # Both slices are trailing-row / trailing-column trims (lane-aligned -> free).
    return mask_p[:B, :D], feat_p[:B, :D]


def init_params(key, input_dim, hidden_dim, encoder_depth=ENCODER_DEPTH):
    """nn.Linear-style init U(-1/sqrt(fan_in), 1/sqrt(fan_in)); weights stored as [in, out]."""
    def linear(k, fan_in, fan_out):
        kw, kb = jax.random.split(k)
        bound = 1.0 / jnp.sqrt(fan_in)
        w = jax.random.uniform(kw, (fan_in, fan_out), jnp.float32, -bound, bound)
        b = jax.random.uniform(kb, (1, fan_out), jnp.float32, -bound, bound)
        return w, b

    keys = jax.random.split(key, encoder_depth + 2)
    enc_w, enc_b = [], []
    in_dim = input_dim
    for d in range(encoder_depth):
        w, b = linear(keys[d], in_dim, hidden_dim)
        enc_w.append(w)
        enc_b.append(b)
        in_dim = hidden_dim
    mask_w, mask_b = linear(keys[encoder_depth], hidden_dim, input_dim)
    feat_w, feat_b = linear(keys[encoder_depth + 1], hidden_dim, input_dim)
    return dict(enc_w=enc_w, enc_b=enc_b,
                mask_w=mask_w, mask_b=mask_b,
                feat_w=feat_w, feat_b=feat_b)


def _reference_forward(x, params):
    h = x
    for w, b in zip(params["enc_w"], params["enc_b"]):
        h = jnp.maximum(h @ w + b, 0.0)
    mask = jax.nn.sigmoid(h @ params["mask_w"] + params["mask_b"])
    feat = jax.nn.sigmoid(h @ params["feat_w"] + params["feat_b"])
    return mask, feat


if __name__ == "__main__":
    batch, input_dim, hidden_dim = 16, 32, 64
    key = jax.random.PRNGKey(0)
    k_x, k_p = jax.random.split(key)

    x = jax.random.normal(k_x, (batch, input_dim), dtype=jnp.float32)
    params = init_params(k_p, input_dim, hidden_dim)
    ref_mask, ref_feat = _reference_forward(x, params)

    # f32 path: exact structural check against the reference.
    prep_f32 = prepare_params(params, compute_dtype=jnp.float32)
    mask32, feat32 = vime_self_forward(x, prep_f32)
    mask32 = jax.block_until_ready(mask32)
    feat32 = jax.block_until_ready(feat32)
    assert mask32.shape == (batch, input_dim) and feat32.shape == (batch, input_dim)
    assert jnp.allclose(mask32, ref_mask, atol=1e-5, rtol=1e-5)
    assert jnp.allclose(feat32, ref_feat, atol=1e-5, rtol=1e-5)

    # bf16 path (default): looser tolerance, bf16 operands with f32 accumulation.
    prep_bf16 = prepare_params(params, compute_dtype=jnp.bfloat16)
    mask16, feat16 = vime_self_forward(x, prep_bf16)
    mask16 = jax.block_until_ready(mask16)
    feat16 = jax.block_until_ready(feat16)
    assert mask16.shape == (batch, input_dim) and feat16.shape == (batch, input_dim)
    assert jnp.allclose(mask16, ref_mask, atol=3e-2, rtol=3e-2)
    assert jnp.allclose(feat16, ref_feat, atol=3e-2, rtol=3e-2)

    print("KERNEL_OK")
</pallas_src>

<mosaic_0001>
module attributes {stable_mosaic.version = 11 : i64} {
  func.func @kernel(%arg0: i32, %arg1: memref<16x128xf32, #tpu.memory_space<vmem>>, %arg2: memref<128x128xf32, #tpu.memory_space<vmem>>, %arg3: memref<1x128xf32, #tpu.memory_space<vmem>>, %arg4: memref<128x128xf32, #tpu.memory_space<vmem>>, %arg5: memref<1x128xf32, #tpu.memory_space<vmem>>, %arg6: memref<128x128xf32, #tpu.memory_space<vmem>>, %arg7: memref<1x128xf32, #tpu.memory_space<vmem>>, %arg8: memref<128x128xf32, #tpu.memory_space<vmem>>, %arg9: memref<1x128xf32, #tpu.memory_space<vmem>>, %arg10: memref<128x256xf32, #tpu.memory_space<vmem>>, %arg11: memref<1x256xf32, #tpu.memory_space<vmem>>, %arg12: memref<16x128xf32, #tpu.memory_space<vmem>>, %arg13: memref<16x128xf32, #tpu.memory_space<vmem>>) attributes {dimension_semantics = [#tpu.dimension_semantics<parallel>], iteration_bounds = array<i64: 1>, scalar_prefetch = 0 : i64, scratch_operands = 0 : i64, tpu.core_type = #tpu.core_type<tc>, window_params = [{transform_indices = @transform_0, window_bounds = array<i64: 16, 128>}, {pipeline_mode = #tpu.pipeline_mode<synchronous>, transform_indices = @transform_1, window_bounds = array<i64: 128, 128>}, {pipeline_mode = #tpu.pipeline_mode<synchronous>, transform_indices = @transform_2, window_bounds = array<i64: 1, 128>}, {pipeline_mode = #tpu.pipeline_mode<synchronous>, transform_indices = @transform_3, window_bounds = array<i64: 128, 128>}, {pipeline_mode = #tpu.pipeline_mode<synchronous>, transform_indices = @transform_4, window_bounds = array<i64: 1, 128>}, {pipeline_mode = #tpu.pipeline_mode<synchronous>, transform_indices = @transform_5, window_bounds = array<i64: 128, 128>}, {pipeline_mode = #tpu.pipeline_mode<synchronous>, transform_indices = @transform_6, window_bounds = array<i64: 1, 128>}, {pipeline_mode = #tpu.pipeline_mode<synchronous>, transform_indices = @transform_7, window_bounds = array<i64: 128, 128>}, {pipeline_mode = #tpu.pipeline_mode<synchronous>, transform_indices = @transform_8, window_bounds = array<i64: 1, 128>}, {pipeline_mode = #tpu.pipeline_mode<synchronous>, transform_indices = @transform_9, window_bounds = array<i64: 128, 256>}, {pipeline_mode = #tpu.pipeline_mode<synchronous>, transform_indices = @transform_10, window_bounds = array<i64: 1, 256>}, {transform_indices = @transform_11, window_bounds = array<i64: 16, 128>}, {transform_indices = @transform_12, window_bounds = array<i64: 16, 128>}]} {
    %c0 = arith.constant 0 : index
    %c0_0 = arith.constant 0 : index
    %0 = vector.load %arg1[%c0, %c0_0] : memref<16x128xf32, #tpu.memory_space<vmem>>, vector<16x128xf32>
    %c0_1 = arith.constant 0 : index
    %c0_2 = arith.constant 0 : index
    %1 = vector.load %arg2[%c0_1, %c0_2] : memref<128x128xf32, #tpu.memory_space<vmem>>, vector<128x128xf32>
    %cst = arith.constant dense<0.000000e+00> : vector<16x128xf32>
    %2 = tpu.matmul %0, %1, %cst {dimension_numbers = #tpu.dot_dimension_numbers<[1], [0], [0], [1], [0, 0, 1, 1], [], []>} : vector<16x128xf32>, vector<128x128xf32>, vector<16x128xf32> -> vector<16x128xf32>
    %c0_3 = arith.constant 0 : index
    %c0_4 = arith.constant 0 : index
    %3 = vector.load %arg3[%c0_3, %c0_4] : memref<1x128xf32, #tpu.memory_space<vmem>>, vector<1x128xf32>
    %4 = vector.broadcast %3 : vector<1x128xf32> to vector<16x128xf32>
    %5 = arith.addf %2, %4 : vector<16x128xf32>
    %cst_5 = arith.constant 0.000000e+00 : f32
    %6 = vector.broadcast %cst_5 : f32 to vector<16x128xf32>
    %7 = arith.maximumf %5, %6 : vector<16x128xf32>
    %c0_6 = arith.constant 0 : index
    %c0_7 = arith.constant 0 : index
    %8 = vector.load %arg4[%c0_6, %c0_7] : memref<128x128xf32, #tpu.memory_space<vmem>>, vector<128x128xf32>
    %cst_8 = arith.constant dense<0.000000e+00> : vector<16x128xf32>
    %9 = tpu.matmul %7, %8, %cst_8 {dimension_numbers = #tpu.dot_dimension_numbers<[1], [0], [0], [1], [0, 0, 1, 1], [], []>} : vector<16x128xf32>, vector<128x128xf32>, vector<16x128xf32> -> vector<16x128xf32>
    %c0_9 = arith.constant 0 : index
    %c0_10 = arith.constant 0 : index
    %10 = vector.load %arg5[%c0_9, %c0_10] : memref<1x128xf32, #tpu.memory_space<vmem>>, vector<1x128xf32>
    %11 = vector.broadcast %10 : vector<1x128xf32> to vector<16x128xf32>
    %12 = arith.addf %9, %11 : vector<16x128xf32>
    %cst_11 = arith.constant 0.000000e+00 : f32
    %13 = vector.broadcast %cst_11 : f32 to vector<16x128xf32>
    %14 = arith.maximumf %12, %13 : vector<16x128xf32>
    %c0_12 = arith.constant 0 : index
    %c0_13 = arith.constant 0 : index
    %15 = vector.load %arg6[%c0_12, %c0_13] : memref<128x128xf32, #tpu.memory_space<vmem>>, vector<128x128xf32>
    %cst_14 = arith.constant dense<0.000000e+00> : vector<16x128xf32>
    %16 = tpu.matmul %14, %15, %cst_14 {dimension_numbers = #tpu.dot_dimension_numbers<[1], [0], [0], [1], [0, 0, 1, 1], [], []>} : vector<16x128xf32>, vector<128x128xf32>, vector<16x128xf32> -> vector<16x128xf32>
    %c0_15 = arith.constant 0 : index
    %c0_16 = arith.constant 0 : index
    %17 = vector.load %arg7[%c0_15, %c0_16] : memref<1x128xf32, #tpu.memory_space<vmem>>, vector<1x128xf32>
    %18 = vector.broadcast %17 : vector<1x128xf32> to vector<16x128xf32>
    %19 = arith.addf %16, %18 : vector<16x128xf32>
    %cst_17 = arith.constant 0.000000e+00 : f32
    %20 = vector.broadcast %cst_17 : f32 to vector<16x128xf32>
    %21 = arith.maximumf %19, %20 : vector<16x128xf32>
    %c0_18 = arith.constant 0 : index
    %c0_19 = arith.constant 0 : index
    %22 = vector.load %arg8[%c0_18, %c0_19] : memref<128x128xf32, #tpu.memory_space<vmem>>, vector<128x128xf32>
    %cst_20 = arith.constant dense<0.000000e+00> : vector<16x128xf32>
    %23 = tpu.matmul %21, %22, %cst_20 {dimension_numbers = #tpu.dot_dimension_numbers<[1], [0], [0], [1], [0, 0, 1, 1], [], []>} : vector<16x128xf32>, vector<128x128xf32>, vector<16x128xf32> -> vector<16x128xf32>
    %c0_21 = arith.constant 0 : index
    %c0_22 = arith.constant 0 : index
    %24 = vector.load %arg9[%c0_21, %c0_22] : memref<1x128xf32, #tpu.memory_space<vmem>>, vector<1x128xf32>
    %25 = vector.broadcast %24 : vector<1x128xf32> to vector<16x128xf32>
    %26 = arith.addf %23, %25 : vector<16x128xf32>
    %cst_23 = arith.constant 0.000000e+00 : f32
    %27 = vector.broadcast %cst_23 : f32 to vector<16x128xf32>
    %28 = arith.maximumf %26, %27 : vector<16x128xf32>
    %c0_24 = arith.constant 0 : index
    %c0_25 = arith.constant 0 : index
    %29 = vector.load %arg10[%c0_24, %c0_25] : memref<128x256xf32, #tpu.memory_space<vmem>>, vector<128x256xf32>
    %cst_26 = arith.constant dense<0.000000e+00> : vector<16x256xf32>
    %30 = tpu.matmul %28, %29, %cst_26 {dimension_numbers = #tpu.dot_dimension_numbers<[1], [0], [0], [1], [0, 0, 1, 1], [], []>} : vector<16x128xf32>, vector<128x256xf32>, vector<16x256xf32> -> vector<16x256xf32>
    %c0_27 = arith.constant 0 : index
    %c0_28 = arith.constant 0 : index
    %31 = vector.load %arg11[%c0_27, %c0_28] : memref<1x256xf32, #tpu.memory_space<vmem>>, vector<1x256xf32>
    %32 = vector.broadcast %31 : vector<1x256xf32> to vector<16x256xf32>
    %33 = arith.addf %30, %32 : vector<16x256xf32>
    %34 = arith.negf %33 : vector<16x256xf32>
    %35 = math.exp %34 : vector<16x256xf32>
    %cst_29 = arith.constant 1.000000e+00 : f32
    %36 = vector.broadcast %cst_29 : f32 to vector<16x256xf32>
    %37 = arith.addf %36, %35 : vector<16x256xf32>
    %38 = arith.divf %36, %37 : vector<16x256xf32>
    %39 = vector.extract_strided_slice %38 {offsets = [0, 0], sizes = [16, 128], strides = [1, 1]} : vector<16x256xf32> to vector<16x128xf32>
    %c0_30 = arith.constant 0 : index
    %c0_31 = arith.constant 0 : index
    %40 = vector.load %arg12[%c0_30, %c0_31] : memref<16x128xf32, #tpu.memory_space<vmem>>, vector<16x128xf32>
    tpu.vector_store %arg12[%c0_30, %c0_31], %39 {strides = array<i32>} : memref<16x128xf32, #tpu.memory_space<vmem>>, vector<16x128xf32>,
    %41 = vector.extract_strided_slice %38 {offsets = [0, 128], sizes = [16, 128], strides = [1, 1]} : vector<16x256xf32> to vector<16x128xf32>
    %c0_32 = arith.constant 0 : index
    %c0_33 = arith.constant 0 : index
    %42 = vector.load %arg13[%c0_32, %c0_33] : memref<16x128xf32, #tpu.memory_space<vmem>>, vector<16x128xf32>
    tpu.vector_store %arg13[%c0_32, %c0_33], %41 {strides = array<i32>} : memref<16x128xf32, #tpu.memory_space<vmem>>, vector<16x128xf32>,
    return
  }
  func.func @transform_0(%arg0: i32) -> (i32, i32) {
    %c0_i32 = arith.constant 0 : i32
    %c0_i32_0 = arith.constant 0 : i32
    return %arg0, %c0_i32 : i32, i32
  }
  func.func @transform_1(%arg0: i32) -> (i32, i32) {
    %c0_i32 = arith.constant 0 : i32
    %c0_i32_0 = arith.constant 0 : i32
    %c0_i32_1 = arith.constant 0 : i32
    return %c0_i32, %c0_i32_0 : i32, i32
  }
  func.func @transform_2(%arg0: i32) -> (i32, i32) {
    %c0_i32 = arith.constant 0 : i32
    %c0_i32_0 = arith.constant 0 : i32
    %c0_i32_1 = arith.constant 0 : i32
    return %c0_i32, %c0_i32_0 : i32, i32
  }
  func.func @transform_3(%arg0: i32) -> (i32, i32) {
    %c0_i32 = arith.constant 0 : i32
    %c0_i32_0 = arith.constant 0 : i32
    %c0_i32_1 = arith.constant 0 : i32
    return %c0_i32, %c0_i32_0 : i32, i32
  }
  func.func @transform_4(%arg0: i32) -> (i32, i32) {
    %c0_i32 = arith.constant 0 : i32
    %c0_i32_0 = arith.constant 0 : i32
    %c0_i32_1 = arith.constant 0 : i32
    return %c0_i32, %c0_i32_0 : i32, i32
  }
  func.func @transform_5(%arg0: i32) -> (i32, i32) {
    %c0_i32 = arith.constant 0 : i32
    %c0_i32_0 = arith.constant 0 : i32
    %c0_i32_1 = arith.constant 0 : i32
    return %c0_i32, %c0_i32_0 : i32, i32
  }
  func.func @transform_6(%arg0: i32) -> (i32, i32) {
    %c0_i32 = arith.constant 0 : i32
    %c0_i32_0 = arith.constant 0 : i32
    %c0_i32_1 = arith.constant 0 : i32
    return %c0_i32, %c0_i32_0 : i32, i32
  }
  func.func @transform_7(%arg0: i32) -> (i32, i32) {
    %c0_i32 = arith.constant 0 : i32
    %c0_i32_0 = arith.constant 0 : i32
    %c0_i32_1 = arith.constant 0 : i32
    return %c0_i32, %c0_i32_0 : i32, i32
  }
  func.func @transform_8(%arg0: i32) -> (i32, i32) {
    %c0_i32 = arith.constant 0 : i32
    %c0_i32_0 = arith.constant 0 : i32
    %c0_i32_1 = arith.constant 0 : i32
    return %c0_i32, %c0_i32_0 : i32, i32
  }
  func.func @transform_9(%arg0: i32) -> (i32, i32) {
    %c0_i32 = arith.constant 0 : i32
    %c0_i32_0 = arith.constant 0 : i32
    %c0_i32_1 = arith.constant 0 : i32
    return %c0_i32, %c0_i32_0 : i32, i32
  }
  func.func @transform_10(%arg0: i32) -> (i32, i32) {
    %c0_i32 = arith.constant 0 : i32
    %c0_i32_0 = arith.constant 0 : i32
    %c0_i32_1 = arith.constant 0 : i32
    return %c0_i32, %c0_i32_0 : i32, i32
  }
  func.func @transform_11(%arg0: i32) -> (i32, i32) {
    %c0_i32 = arith.constant 0 : i32
    %c0_i32_0 = arith.constant 0 : i32
    return %arg0, %c0_i32 : i32, i32
  }
  func.func @transform_12(%arg0: i32) -> (i32, i32) {
    %c0_i32 = arith.constant 0 : i32
    %c0_i32_0 = arith.constant 0 : i32
    return %arg0, %c0_i32 : i32, i32
  }
}

</mosaic_0001>

<bundles_post_ra>
// kernel: tpu_custom_call.1
= control target key start
LH: loop header
LB: loop body
LE: loop exit
PB: predicated region body
PF: predicated region fallthrough
CT: control target
= control target key end

     0   :  { %18 = vsyncpa [#allocation3], 0  ;;  %s1546_s0 = inlined_call_operand.hbm [shape: f32[16,128], index: 0, kind: input, shape index: {}]   ;;  %s1547_s1 = inlined_call_operand.hbm [shape: f32[128,128], index: 1, kind: input, shape index: {}]   ;;  %s1548_s2 = inlined_call_operand.vmem [shape: f32[1,128], index: 2, kind: input, shape index: {}]   ;;  %s1549_s3 = inlined_call_operand.hbm [shape: f32[128,128], index: 3, kind: input, shape index: {}]   ;;  %s1550_s4 = inlined_call_operand.vmem [shape: f32[1,128], index: 4, kind: input, shape index: {}]   ;;  %s1551_s5 = inlined_call_operand.hbm [shape: f32[128,128], index: 5, kind: input, shape index: {}]   ;;  %s1552_s6 = inlined_call_operand.vmem [shape: f32[1,128], index: 6, kind: input, shape index: {}]   ;;  %s1553_s7 = inlined_call_operand.hbm [shape: f32[128,128], index: 7, kind: input, shape index: {}]   ;;  %s1554_s8 = inlined_call_operand.vmem [shape: f32[1,128], index: 8, kind: input, shape index: {}]   ;;  %s1555_s9 = inlined_call_operand.hbm [shape: f32[128,256], index: 9, kind: input, shape index: {}]   ;;  %s1556_s10 = inlined_call_operand.vmem [shape: f32[1,256], index: 10, kind: input, shape index: {}]   ;;  %s1557_s11 = inlined_call_operand.hbm [shape: f32[16,128], index: 11, kind: output, shape index: {0}]   ;;  %s1558_s12 = inlined_call_operand.hbm [shape: f32[16,128], index: 12, kind: output, shape index: {1}]  }
   0x1   :  { %19 = vsyncpa [#allocation6], 0 }
   0x2   :  { %20 = vsyncpa [#allocation9], 0 }
   0x3   :  { %21 = vsyncpa [#allocation12], 0 }
   0x4   :  { %22 = vsyncpa [#allocation4], 0 }
   0x5   :  { %23 = vsyncpa [#allocation15], 0  ;;  %s1308_s21 = smov [#allocation5]   ;;  %s1309_s23 = smov [#allocation8]  }
   0x6   :  { %s41_s22 = sshll.u32 %s1308_s21, 4  ;;  %s69_s24 = sshll.u32 %s1309_s23, 4  ;;  %s42_s22 = int_to_ptr.vmem [resolvable:$true] %s41_s22  ;;  %s1386_s24 = int_to_ptr.vmem [resolvable:$true] %s69_s24 }
   0x7   :  { %s1120_s27 = scalar_lea.hbm %s1547_s1, 2048 }
   0x8   :  { %p1121_p0 = scmp.ne.s32.totalorder %s1547_s1, %s1120_s27  ;;  %p1124_p1 = scmp.lt.u32.totalorder %s1120_s27, %s1547_s1 }
   0xa   :  { %p1126_p2 = pnand %p1124_p1, %p1121_p0 }
   0xc   :  { %1129 = shalt.err (!%p1126_p2)
}
   0xd   :  { %s1130_s14 = scalar_lea.vmem %s42_s22, 2048  ;;  %p1135_p4 = scmp.lt.s32.totalorder %s42_s22, %s42_s22 }
   0xe   :  { %p1131_p3 = scmp.ne.s32.totalorder %s42_s22, %s1130_s14  ;;  %p1136_p5 = scmp.lt.s32.totalorder %s1130_s14, %s1130_s14 }
  0x10   :  { %p1137_p6 = por %p1136_p5, %p1135_p4 }
  0x12   :  { %p1138_p7 = pnand %p1137_p6, %p1131_p3 }
  0x14   :  { %1141 = shalt.err (!%p1138_p7)
}
  0x15   :  { %s1310_s15 = smov 128   ;;  %s1311_s16 = smov 8  }
  0x16   :  { %47 = dma.hbm_to_vmem [thread:$0]  %s1547_s1, 2048, %s42_s22, [#allocation6], %s1310_s15, %s1310_s15, %s1311_s16  }
  0x17   :  { %s1142_s21 = scalar_lea.hbm %s1551_s5, 2048 }
  0x18   :  { %p1143_p8 = scmp.ne.s32.totalorder %s1551_s5, %s1142_s21  ;;  %p1146_p9 = scmp.lt.u32.totalorder %s1142_s21, %s1551_s5 }
  0x1a   :  { %p1148_p10 = pnand %p1146_p9, %p1143_p8 }
  0x1c   :  { %1151 = shalt.err (!%p1148_p10)
}
  0x1d   :  { %s1152_s28 = scalar_lea.vmem %s1386_s24, 2048  ;;  %p1157_p12 = scmp.lt.s32.totalorder %s1386_s24, %s1386_s24 }
  0x1e   :  { %p1153_p11 = scmp.ne.s32.totalorder %s1386_s24, %s1152_s28  ;;  %p1158_p13 = scmp.lt.s32.totalorder %s1152_s28, %s1152_s28 }
  0x20   :  { %p1159_p0 = por %p1158_p13, %p1157_p12 }
  0x22   :  { %p1160_p1 = pnand %p1159_p0, %p1153_p11 }
  0x24   :  { %1163 = shalt.err (!%p1160_p1)
}
  0x25   :  { %75 = dma.hbm_to_vmem [thread:$0]  %s1551_s5, 2048, %s1386_s24, [#allocation9], %s1310_s15, %s1310_s15, %s1311_s16  }
  0x26   :  { %s1312_s29 = smov [#allocation2]   ;;  %s1313_s13 = smov [#allocation7]  }
  0x27   :  { %s29_s30 = sshll.u32 %s1312_s29, 4  ;;  %s55_s14 = sshll.u32 %s1313_s13, 4  ;;  %s30_s30 = int_to_ptr.vmem [resolvable:$true] %s29_s30  ;;  %s1423_s14 = int_to_ptr.vmem [resolvable:$true] %s55_s14 }
  0x28   :  { %s1164_s19 = scalar_lea.hbm %s1546_s0, 256 }
  0x29   :  { %p1165_p2 = scmp.ne.s32.totalorder %s1546_s0, %s1164_s19  ;;  %p1168_p3 = scmp.lt.u32.totalorder %s1164_s19, %s1546_s0 }
  0x2b   :  { %p1170_p4 = pnand %p1168_p3, %p1165_p2 }
  0x2d   :  { %1173 = shalt.err (!%p1170_p4)
}
  0x2e   :  { %s1174_s5 = scalar_lea.vmem %s30_s30, 256  ;;  %p1179_p6 = scmp.lt.s32.totalorder %s30_s30, %s30_s30 }
  0x2f   :  { %p1175_p5 = scmp.ne.s32.totalorder %s30_s30, %s1174_s5  ;;  %p1180_p7 = scmp.lt.s32.totalorder %s1174_s5, %s1174_s5 }
  0x31   :  { %p1181_p8 = por %p1180_p7, %p1179_p6 }
  0x33   :  { %p1182_p9 = pnand %p1181_p8, %p1175_p5 }
  0x35   :  { %1185 = shalt.err (!%p1182_p9)
}
  0x36   :  { %35 = dma.hbm_to_vmem [thread:$0]  %s1546_s0, 256, %s30_s30, [#allocation3], %s1310_s15, %s1310_s15, %s1311_s16  }
  0x37   :  { %s1186_s1 = scalar_lea.hbm %s1549_s3, 2048 }
  0x38   :  { %p1187_p10 = scmp.ne.s32.totalorder %s1549_s3, %s1186_s1  ;;  %p1190_p11 = scmp.lt.u32.totalorder %s1186_s1, %s1549_s3 }
  0x3a   :  { %p1192_p12 = pnand %p1190_p11, %p1187_p10 }
  0x3c   :  { %1195 = shalt.err (!%p1192_p12)
}
  0x3d   :  { %s1196_s18 = scalar_lea.vmem %s1423_s14, 2048  ;;  %p1201_p0 = scmp.lt.s32.totalorder %s1423_s14, %s1423_s14 }
  0x3e   :  { %p1197_p13 = scmp.ne.s32.totalorder %s1423_s14, %s1196_s18  ;;  %p1202_p1 = scmp.lt.s32.totalorder %s1196_s18, %s1196_s18 }
  0x40   :  { %p1203_p2 = por %p1202_p1, %p1201_p0 }
  0x42   :  { %p1204_p3 = pnand %p1203_p2, %p1197_p13 }
  0x44   :  { %1207 = shalt.err (!%p1204_p3)
}
  0x45   :  { %61 = dma.hbm_to_vmem [thread:$0]  %s1549_s3, 2048, %s1423_s14, [#allocation6], %s1310_s15, %s1310_s15, %s1311_s16  }
  0x46   :  { %s1314_s19 = smov [#allocation10]   ;;  %s1315_s21 = smov [#allocation11]  }
  0x47   :  { %s83_s20 = sshll.u32 %s1314_s19, 4  ;;  %s97_s23 = sshll.u32 %s1315_s21, 4  ;;  %s84_s20 = int_to_ptr.vmem [resolvable:$true] %s83_s20  ;;  %s1460_s23 = int_to_ptr.vmem [resolvable:$true] %s97_s23 }
  0x48   :  { %s1208_s24 = scalar_lea.hbm %s1553_s7, 2048 }
  0x49   :  { %p1209_p4 = scmp.ne.s32.totalorder %s1553_s7, %s1208_s24  ;;  %p1212_p5 = scmp.lt.u32.totalorder %s1208_s24, %s1553_s7 }
  0x4b   :  { %p1214_p6 = pnand %p1212_p5, %p1209_p4 }
  0x4d   :  { %1217 = shalt.err (!%p1214_p6)
}
  0x4e   :  { %s1218_s3 = scalar_lea.vmem %s84_s20, 2048  ;;  %p1223_p8 = scmp.lt.s32.totalorder %s84_s20, %s84_s20 }
  0x4f   :  { %p1219_p7 = scmp.ne.s32.totalorder %s84_s20, %s1218_s3  ;;  %p1224_p9 = scmp.lt.s32.totalorder %s1218_s3, %s1218_s3 }
  0x51   :  { %p1225_p10 = por %p1224_p9, %p1223_p8 }
  0x53   :  { %p1226_p11 = pnand %p1225_p10, %p1219_p7 }
  0x55   :  { %1229 = shalt.err (!%p1226_p11)
}
  0x56   :  { %89 = dma.hbm_to_vmem [thread:$0]  %s1553_s7, 2048, %s84_s20, [#allocation9], %s1310_s15, %s1310_s15, %s1311_s16  }
  0x57   :  { %s1230_s17 = scalar_lea.hbm %s1555_s9, 4096 }
  0x58   :  { %p1231_p12 = scmp.ne.s32.totalorder %s1555_s9, %s1230_s17  ;;  %p1234_p13 = scmp.lt.u32.totalorder %s1230_s17, %s1555_s9 }
  0x5a   :  { %p1236_p0 = pnand %p1234_p13, %p1231_p12 }
  0x5c   :  { %1239 = shalt.err (!%p1236_p0)
}
  0x5d   :  { %s1240_s21 = scalar_lea.vmem %s1460_s23, 4096  ;;  %p1245_p2 = scmp.lt.s32.totalorder %s1460_s23, %s1460_s23 }
  0x5e   :  { %p1241_p1 = scmp.ne.s32.totalorder %s1460_s23, %s1240_s21  ;;  %p1246_p3 = scmp.lt.s32.totalorder %s1240_s21, %s1240_s21 }
  0x60   :  { %p1247_p4 = por %p1246_p3, %p1245_p2 }
  0x62   :  { %p1248_p5 = pnand %p1247_p4, %p1241_p1 }
  0x64   :  { %1251 = shalt.err (!%p1248_p5)
}
  0x65   :  { %s1316_s7 = smov 256   ;;  %s1317_s20 = smov 16  }
  0x66   :  { %103 = dma.hbm_to_vmem [thread:$0]  %s1555_s9, 4096, %s1460_s23, [#allocation12], %s1316_s7, %s1316_s7, %s1317_s20  }
  0x67   :  { %1296 = dma.done.wait [#allocation3], 256  }
  0x68   :  { %1297 = vsyncadd [#allocation3], 4294967040 }
  0x69   :  { %1298 = dma.done.wait [#allocation6], 4096  }
  0x6a   :  { %1299 = vsyncadd [#allocation6], 4294963200 }
  0x6b   :  { %1300 = dma.done.wait [#allocation9], 4096  }
  0x6c   :  { %1301 = vsyncadd [#allocation9], 4294963200 }
  0x6d   :  { %1302 = dma.done.wait [#allocation12], 4096  }
  0x6e   :  { %1303 = vsyncadd [#allocation12], 4294963200  ;;  %v126_v0 = vld [vmem:[#allocation5] sm:$0xff]  ;;  %v127_v1 = vld [vmem:[#allocation5 + $0x8] sm:$0xff]  ;;  %s1320_s3 = smov [#allocation14]  }
  0x6f   :  { %v128_v2 = vld [vmem:[#allocation5 + $0x10] sm:$0xff]  ;;  %v931_v3 = vpack.c.bf16 %v127_v1, %v126_v0  ;;  %v129_v4 = vld [vmem:[#allocation5 + $0x18] sm:$0xff]  ;;  %v130_v6 = vld [vmem:[#allocation5 + $0x20] sm:$0xff]  ;;  %s692_s14 = sshll.u32 %s1320_s3, 4  ;;  %s1509_s14 = int_to_ptr.vmem [resolvable:$true] %s692_s14 }
  0x70   :  { %v935_v5 = vpack.c.bf16 %v129_v4, %v128_v2  ;;  %v131_v7 = vld [vmem:[#allocation5 + $0x28] sm:$0xff]  ;;  %v124_v9 = vld [vmem:[#allocation2] sm:$0xff]  ;;  %v133_v11 = vld [vmem:[#allocation5 + $0x38] sm:$0xff] }
  0x71   :  { %932 = vmatprep.subr.bf16.mxu1 %v931_v3  ;;  %v939_v8 = vpack.c.bf16 %v131_v7, %v130_v6  ;;  %v132_v10 = vld [vmem:[#allocation5 + $0x30] sm:$0xff]  ;;  %823 = vmatprep.mubr.f32.mxu1 %v124_v9  ;;  %v134_v13 = vld [vmem:[#allocation5 + $0x40] sm:$0xff]  ;;  %v135_v14 = vld [vmem:[#allocation5 + $0x48] sm:$0xff] }
  0x72   :  { %934 = vmatpush3.bf16.msra.mxu1 %v931_v3  ;;  %v943_v12 = vpack.c.bf16 %v133_v11, %v132_v10  ;;  %v947_v15 = vpack.c.bf16 %v135_v14, %v134_v13  ;;  %v136_v16 = vld [vmem:[#allocation5 + $0x50] sm:$0xff]  ;;  %v137_v17 = vld [vmem:[#allocation5 + $0x58] sm:$0xff]  ;;  %v138_v19 = vld [vmem:[#allocation5 + $0x60] sm:$0xff] }
  0x73   :  { %936 = vmatprep.subr.bf16.mxu1 %v935_v5  ;;  %v951_v18 = vpack.c.bf16 %v137_v17, %v136_v16  ;;  %v139_v20 = vld [vmem:[#allocation5 + $0x68] sm:$0xff]  ;;  %v140_v22 = vld [vmem:[#allocation5 + $0x70] sm:$0xff]  ;;  %v141_v23 = vld [vmem:[#allocation5 + $0x78] sm:$0xff] }
  0x74   :  { %v955_v21 = vpack.c.bf16 %v139_v20, %v138_v19  ;;  %v959_v24 = vpack.c.bf16 %v141_v23, %v140_v22  ;;  %v226_v25 = vld [vmem:[#allocation7] sm:$0xff]  ;;  %v227_v26 = vld [vmem:[#allocation7 + $0x8] sm:$0xff]  ;;  %v228_v28 = vld [vmem:[#allocation7 + $0x10] sm:$0xff] }
  0x75   :  { %v963_v27 = vpack.c.bf16 %v227_v26, %v226_v25  ;;  %v229_v29 = vld [vmem:[#allocation7 + $0x18] sm:$0xff]  ;;  %v230_v32 = vld [vmem:[#allocation7 + $0x20] sm:$0xff]  ;;  %v231_v33 = vld [vmem:[#allocation7 + $0x28] sm:$0xff] }
  0x76   :  { %938 = vmatpush3.bf16.msra.mxu1 %v935_v5  ;;  %v125_v30 = vld [vmem:[#allocation2 + $0x8] sm:$0xff]  ;;  %v967_v31 = vpack.c.bf16 %v229_v29, %v228_v28  ;;  %v971_v34 = vpack.c.bf16 %v231_v33, %v230_v32  ;;  %v232_v35 = vld [vmem:[#allocation7 + $0x30] sm:$0xff]  ;;  %v234_v38 = vld [vmem:[#allocation7 + $0x40] sm:$0xff] }
  0x77   :  { %940 = vmatprep.subr.bf16.mxu1 %v939_v8  ;;  %v233_v36 = vld [vmem:[#allocation7 + $0x38] sm:$0xff]  ;;  %v235_v39 = vld [vmem:[#allocation7 + $0x48] sm:$0xff]  ;;  %v236_v41 = vld [vmem:[#allocation7 + $0x50] sm:$0xff] }
  0x78   :  { %v975_v37 = vpack.c.bf16 %v233_v36, %v232_v35  ;;  %v979_v40 = vpack.c.bf16 %v235_v39, %v234_v38  ;;  %v237_v42 = vld [vmem:[#allocation7 + $0x58] sm:$0xff]  ;;  %v238_v44 = vld [vmem:[#allocation7 + $0x60] sm:$0xff]  ;;  %v239_v45 = vld [vmem:[#allocation7 + $0x68] sm:$0xff] }
  0x79   :  { %v983_v43 = vpack.c.bf16 %v237_v42, %v236_v41  ;;  %v987_v46 = vpack.c.bf16 %v239_v45, %v238_v44  ;;  %v240_v47 = vld [vmem:[#allocation7 + $0x70] sm:$0xff]  ;;  %v241_v48 = vld [vmem:[#allocation7 + $0x78] sm:$0xff]  ;;  %v326_v50 = vld [vmem:[#allocation8] sm:$0xff] }
  0x7a   :  { %942 = vmatpush3.bf16.msra.mxu1 %v939_v8  ;;  %v991_v49 = vpack.c.bf16 %v241_v48, %v240_v47  ;;  %v327_v51 = vld [vmem:[#allocation8 + $0x8] sm:$0xff]  ;;  %v328_v52 = vld [vmem:[#allocation8 + $0x10] sm:$0xff]  ;;  %v329_v54 = vld [vmem:[#allocation8 + $0x18] sm:$0xff] }
  0x7b   :  { %944 = vmatprep.subr.bf16.mxu1 %v943_v12  ;;  %v995_v53 = vpack.c.bf16 %v327_v51, %v326_v50  ;;  %v999_v55 = vpack.c.bf16 %v329_v54, %v328_v52  ;;  %v330_v56 = vld [vmem:[#allocation8 + $0x20] sm:$0xff]  ;;  %v331_v57 = vld [vmem:[#allocation8 + $0x28] sm:$0xff]  ;;  %v332_v59 = vld [vmem:[#allocation8 + $0x30] sm:$0xff] }
  0x7c   :  { %v1003_v58 = vpack.c.bf16 %v331_v57, %v330_v56  ;;  %v333_v60 = vld [vmem:[#allocation8 + $0x38] sm:$0xff]  ;;  %v334_v62 = vld [vmem:[#allocation8 + $0x40] sm:$0xff]  ;;  %v335_v63 = vld [vmem:[#allocation8 + $0x48] sm:$0xff] }
  0x7d   :  { %996 = vmatprep.subr.bf16.mxu0 %v995_v53  ;;  %v1007_v61 = vpack.c.bf16 %v333_v60, %v332_v59  ;;  %v1011_v0 = vpack.c.bf16 %v335_v63, %v334_v62  ;;  %v336_v1 = vld [vmem:[#allocation8 + $0x50] sm:$0xff]  ;;  %v337_v2 = vld [vmem:[#allocation8 + $0x58] sm:$0xff]  ;;  %v338_v4 = vld [vmem:[#allocation8 + $0x60] sm:$0xff] }
  0x7e   :  { %946 = vmatpush3.bf16.msra.mxu1 %v943_v12  ;;  %998 = vmatpush3.bf16.msra.mxu0 %v995_v53  ;;  %v1015_v3 = vpack.c.bf16 %v337_v2, %v336_v1  ;;  %v339_v5 = vld [vmem:[#allocation8 + $0x68] sm:$0xff]  ;;  %v711_v7 = vld [vmem:[%s1548_s2] ss:$0 sm:$0xff]  ;;  %v426_v17 = vld [vmem:[#allocation10] sm:$0xff] }
  0x7f   :  { %948 = vmatprep.subr.bf16.mxu1 %v947_v15  ;;  %1000 = vmatprep.subr.bf16.mxu0 %v999_v55  ;;  %v1019_v6 = vpack.c.bf16 %v339_v5, %v338_v4  ;;  %v340_v14 = vld [vmem:[#allocation8 + $0x70] sm:$0xff]  ;;  %v430_v23 = vld [vmem:[#allocation10 + $0x20] sm:$0xff]  ;;  %v437_v33 = vld [vmem:[#allocation10 + $0x58] sm:$0xff] }
  0x80   :  { %v428_v19 = vld [vmem:[#allocation10 + $0x10] sm:$0xff]  ;;  %v434_v29 = vld [vmem:[#allocation10 + $0x40] sm:$0xff]  ;;  %v439_v36 = vld [vmem:[#allocation10 + $0x68] sm:$0xff] }
  0x81   :  { %v432_v26 = vld [vmem:[#allocation10 + $0x30] sm:$0xff]  ;;  %v438_v35 = vld [vmem:[#allocation10 + $0x60] sm:$0xff]  ;;  %v527_v48 = vld [vmem:[#allocation11 + $0x8] sm:$0xff] }
  0x82   :  { %950 = vmatpush3.bf16.msra.mxu1 %v947_v15  ;;  %1002 = vmatpush3.bf16.msra.mxu0 %v999_v55  ;;  %v341_v15 = vld [vmem:[#allocation8 + $0x78] sm:$0xff]  ;;  %v436_v32 = vld [vmem:[#allocation10 + $0x50] sm:$0xff]  ;;  %v526_v50 = vld [vmem:[#allocation11] sm:$0xff] }
  0x83   :  { %952 = vmatprep.subr.bf16.mxu1 %v951_v18  ;;  %1004 = vmatprep.subr.bf16.mxu0 %v1003_v58  ;;  %v1023_v16 = vpack.c.bf16 %v341_v15, %v340_v14  ;;  %v712_v38 = vld [vmem:[%s1550_s4] ss:$0 sm:$0xff]  ;;  %v531_v53 = vld [vmem:[#allocation11 + $0x28] sm:$0xff]  ;;  %v533_v54 = vld [vmem:[#allocation11 + $0x38] sm:$0xff] }
  0x84   :  { %v440_v45 = vld [vmem:[#allocation10 + $0x70] sm:$0xff]  ;;  %v1063_v56 = vpack.c.bf16 %v533_v54, %v531_v53  ;;  %v530_v57 = vld [vmem:[#allocation11 + $0x20] sm:$0xff]  ;;  %v535_v59 = vld [vmem:[#allocation11 + $0x48] sm:$0xff] }
  0x85   :  { %v528_v52 = vld [vmem:[#allocation11 + $0x10] sm:$0xff]  ;;  %v537_v60 = vld [vmem:[#allocation11 + $0x58] sm:$0xff]  ;;  %v534_v63 = vld [vmem:[#allocation11 + $0x40] sm:$0xff] }
  0x86   :  { %954 = vmatpush3.bf16.msra.mxu1 %v951_v18  ;;  %1006 = vmatpush3.bf16.msra.mxu0 %v1003_v58  ;;  %v427_v18 = vld [vmem:[#allocation10 + $0x8] sm:$0xff]  ;;  %v1061_v55 = vpack.c.bf16 %v528_v52, %v526_v50  ;;  %v532_v58 = vld [vmem:[#allocation11 + $0x30] sm:$0xff]  ;;  %v1067_v62 = vpack.c.bf16 %v537_v60, %v535_v59  ;;  %v541_v2 = vld [vmem:[#allocation11 + $0x78] sm:$0xff] }
  0x87   :  { %956 = vmatprep.subr.bf16.mxu1 %v955_v21  ;;  %1008 = vmatprep.subr.bf16.mxu0 %v1007_v61  ;;  %v1027_v20 = vpack.c.bf16 %v427_v18, %v426_v17  ;;  %v539_v1 = vld [vmem:[#allocation11 + $0x68] sm:$0xff]  ;;  %v538_v5 = vld [vmem:[#allocation11 + $0x60] sm:$0xff]  ;;  %v549_v14 = vld [vmem:[#allocation11 + $0xb8] sm:$0xff] }
  0x88   :  { %v1071_v4 = vpack.c.bf16 %v541_v2, %v539_v1  ;;  %v546_v17 = vld [vmem:[#allocation11 + $0xa0] sm:$0xff]  ;;  %v548_v18 = vld [vmem:[#allocation11 + $0xb0] sm:$0xff] }
  0x89   :  { %v558_v50 = vld [vmem:[%s1556_s10] sm:$0x3] }
  0x8a   :  { %958 = vmatpush3.bf16.msra.mxu1 %v955_v21  ;;  %1010 = vmatpush3.bf16.msra.mxu0 %v1007_v61  ;;  %v429_v21 = vld [vmem:[#allocation10 + $0x18] sm:$0xff]  ;;  %v1065_v61 = vpack.c.bf16 %v532_v58, %v530_v57 }
  0x8b   :  { %960 = vmatprep.subr.bf16.mxu1 %v959_v24  ;;  %1012 = vmatprep.subr.bf16.mxu0 %v1011_v0  ;;  %v1031_v22 = vpack.c.bf16 %v429_v21, %v428_v19  ;;  %v551_v19 = vld [vmem:[#allocation11 + $0xc8] sm:$0xff]  ;;  %v1081_v21 = vpack.c.bf16 %v548_v18, %v546_v17 }
  0x8e   :  { %962 = vmatpush3.bf16.msra.mxu1 %v959_v24  ;;  %1014 = vmatpush3.bf16.msra.mxu0 %v1011_v0  ;;  %v431_v24 = vld [vmem:[#allocation10 + $0x28] sm:$0xff]  ;;  %v536_v0 = vld [vmem:[#allocation11 + $0x50] sm:$0xff] }
  0x8f   :  { %964 = vmatprep.subr.bf16.mxu1 %v963_v27  ;;  %1016 = vmatprep.subr.bf16.mxu0 %v1015_v3  ;;  %v1035_v25 = vpack.c.bf16 %v431_v24, %v430_v23  ;;  %v550_v23 = vld [vmem:[#allocation11 + $0xc0] sm:$0xff]  ;;  %v552_v24 = vld [vmem:[#allocation11 + $0xd0] sm:$0xff] }
  0x91   :  { %824 = vmatmul.mubr.f32.vlgmr.msra.gmra.mrb[0].mxu1 %v125_v30  ;;  %v435_v30 = vld [vmem:[#allocation10 + $0x48] sm:$0xff] }
  0x92   :  { %966 = vmatpush3.bf16.msra.mxu1 %v963_v27  ;;  %1018 = vmatpush3.bf16.msra.mxu0 %v1015_v3  ;;  %v433_v27 = vld [vmem:[#allocation10 + $0x38] sm:$0xff]  ;;  %v1069_v3 = vpack.c.bf16 %v536_v0, %v534_v63 }
  0x93   :  { %968 = vmatprep.subr.bf16.mxu1 %v967_v31  ;;  %1020 = vmatprep.subr.bf16.mxu0 %v1019_v6  ;;  %v1039_v28 = vpack.c.bf16 %v433_v27, %v432_v26  ;;  %v713_v26 = vld [vmem:[%s1552_s6] ss:$0 sm:$0xff] }
  0x96   :  { %970 = vmatpush3.bf16.msra.mxu1 %v967_v31  ;;  %1022 = vmatpush3.bf16.msra.mxu0 %v1019_v6  ;;  %v1043_v31 = vpack.c.bf16 %v435_v30, %v434_v29  ;;  %v540_v6 = vld [vmem:[#allocation11 + $0x70] sm:$0xff] }
  0x97   :  { %972 = vmatprep.subr.bf16.mxu1 %v971_v34  ;;  %1024 = vmatprep.subr.bf16.mxu0 %v1023_v16 }
  0x9a   :  { %974 = vmatpush3.bf16.msra.mxu1 %v971_v34  ;;  %1026 = vmatpush3.bf16.msra.mxu0 %v1023_v16  ;;  %v1047_v34 = vpack.c.bf16 %v437_v33, %v436_v32  ;;  %v555_v33 = vld [vmem:[#allocation11 + $0xe8] sm:$0xff] }
  0x9b   :  { %976 = vmatprep.subr.bf16.mxu1 %v975_v37 }
  0x9e   :  { %978 = vmatpush3.bf16.msra.mxu1 %v975_v37  ;;  %v1051_v37 = vpack.c.bf16 %v439_v36, %v438_v35  ;;  %v554_v36 = vld [vmem:[#allocation11 + $0xe0] sm:$0xff] }
  0x9f   :  { %980 = vmatprep.subr.bf16.mxu1 %v979_v40 }
  0xa2   :  { %982 = vmatpush3.bf16.msra.mxu1 %v979_v40 }
  0xa3   :  { %984 = vmatprep.subr.bf16.mxu1 %v983_v43 }
  0xa6   :  { %986 = vmatpush3.bf16.msra.mxu1 %v983_v43 }
  0xa7   :  { %988 = vmatprep.subr.bf16.mxu1 %v987_v46 }
  0xaa   :  { %990 = vmatpush3.bf16.msra.mxu1 %v987_v46  ;;  %v441_v46 = vld [vmem:[#allocation10 + $0x78] sm:$0xff] }
  0xab   :  { %992 = vmatprep.subr.bf16.mxu1 %v991_v49  ;;  %v1055_v47 = vpack.c.bf16 %v441_v46, %v440_v45 }
  0xae   :  { %994 = vmatpush3.bf16.msra.mxu1 %v991_v49  ;;  %v529_v49 = vld [vmem:[#allocation11 + $0x18] sm:$0xff] }
  0xaf   :  { %1028 = vmatprep.subr.bf16.mxu1 %v1027_v20  ;;  %v1059_v51 = vpack.c.bf16 %v529_v49, %v527_v48 }
  0xb1   :  { %1060 = vmatprep.subr.bf16.mxu0 %v1059_v51 }
 0x164   :  { %v825_v8 = vpop.f32.mrb[0].mxu1 }
 0x165   :  { %v221_v9 = vadd.f32 %v825_v8, %v711_v7  ;;  %v215_v10 = vpop.f32.mrb[1].mxu1  ;;  %v545_v8 = vld [vmem:[#allocation11 + $0x98] sm:$0xff] }
 0x166   :  { %v216_v11 = vadd.f32 %v711_v7, %v215_v10  ;;  %v543_v7 = vld [vmem:[#allocation11 + $0x88] sm:$0xff] }
 0x167   :  { %v225_v13 = vmax.f32 %v221_v9, 0.0  ;;  %v1073_v9 = vpack.c.bf16 %v540_v6, %v538_v5  ;;  %v1075_v10 = vpack.c.bf16 %v545_v8, %v543_v7 }
 0x168   :  { %v224_v12 = vmax.f32 %v216_v11, 0.0  ;;  %v542_v11 = vld [vmem:[#allocation11 + $0x80] sm:$0xff] }
 0x16a   :  { %858 = vmatprep.mubr.f32.mxu1 %v224_v12  ;;  %v544_v12 = vld [vmem:[#allocation11 + $0x90] sm:$0xff] }
 0x16b   :  { %859 = vmatmul.mubr.f32.vlgmr.msra.gmra.mrb[2].mxu1 %v225_v13  ;;  %v547_v13 = vld [vmem:[#allocation11 + $0xa8] sm:$0xff]  ;;  %v1077_v15 = vpack.c.bf16 %v544_v12, %v542_v11 }
 0x16c   :  { %1030 = vmatpush3.bf16.msra.mxu1 %v1027_v20  ;;  %v1079_v16 = vpack.c.bf16 %v549_v14, %v547_v13  ;;  %v553_v20 = vld [vmem:[#allocation11 + $0xd8] sm:$0xff] }
 0x16d   :  { %1032 = vmatprep.subr.bf16.mxu1 %v1031_v22 }
 0x170   :  { %1034 = vmatpush3.bf16.msra.mxu1 %v1031_v22  ;;  %v1083_v22 = vpack.c.bf16 %v553_v20, %v551_v19 }
 0x171   :  { %1036 = vmatprep.subr.bf16.mxu1 %v1035_v25 }
 0x174   :  { %1038 = vmatpush3.bf16.msra.mxu1 %v1035_v25  ;;  %v1085_v25 = vpack.c.bf16 %v552_v24, %v550_v23 }
 0x175   :  { %1040 = vmatprep.subr.bf16.mxu1 %v1039_v28 }
 0x178   :  { %1042 = vmatpush3.bf16.msra.mxu1 %v1039_v28 }
 0x179   :  { %1044 = vmatprep.subr.bf16.mxu1 %v1043_v31 }
 0x17c   :  { %1046 = vmatpush3.bf16.msra.mxu1 %v1043_v31 }
 0x17d   :  { %1048 = vmatprep.subr.bf16.mxu1 %v1047_v34 }
 0x180   :  { %1050 = vmatpush3.bf16.msra.mxu1 %v1047_v34  ;;  %v557_v34 = vld [vmem:[#allocation11 + $0xf8] sm:$0xff] }
 0x181   :  { %1052 = vmatprep.subr.bf16.mxu1 %v1051_v37  ;;  %v1087_v35 = vpack.c.bf16 %v557_v34, %v555_v33 }
 0x184   :  { %1054 = vmatpush3.bf16.msra.mxu1 %v1051_v37  ;;  %v556_v37 = vld [vmem:[#allocation11 + $0xf0] sm:$0xff] }
 0x185   :  { %1056 = vmatprep.subr.bf16.mxu1 %v1055_v47 }
 0x188   :  { %1058 = vmatpush3.bf16.msra.mxu1 %v1055_v47  ;;  %v560_v47 = vlaneseq }
 0x18a   :  { %v561_v48 = vshrl.u32 %v560_v47, 7 }
 0x18c   :  { %v562_v49 = vsub.s32 0, %v561_v48  ;;  %v566_v51 = vsub.s32 1, %v561_v48 }
 0x18e   :  { %v563_v52 = vrot.slane %v558_v50, %v562_v49  ;;  %v567_v53 = vrot.slane %v558_v50, %v566_v51 }
 0x23e   :  { %v860_v39 = vpop.f32.mrb[2].mxu1 }
 0x23f   :  { %v321_v40 = vadd.f32 %v860_v39, %v712_v38  ;;  %v315_v41 = vpop.f32.mrb[3].mxu1  ;;  %v1318_v39 = vmov 0.0  }
 0x240   :  { %v316_v42 = vadd.f32 %v712_v38, %v315_v41  ;;  %v1089_v38 = vpack.c.bf16 %v556_v37, %v554_v36 }
 0x241   :  { %v325_v44 = vmax.f32 %v321_v40, 0.0  ;;  %v714_v40 = vld [vmem:[%s1554_s8] ss:$0 sm:$0xff]  ;;  %s1319_s8 = smov [#allocation13]  }
 0x242   :  { %v324_v43 = vmax.f32 %v316_v42, 0.0  ;;  %s680_s10 = sshll.u32 %s1319_s8, 4  ;;  %s681_s10 = int_to_ptr.vmem [resolvable:$true] %s680_s10 }
 0x243   :  { %s1252_s22 = scalar_lea.vmem %s681_s10, 256  ;;  %p1257_p7 = scmp.lt.s32.totalorder %s681_s10, %s681_s10 }
 0x244   :  { %893 = vmatprep.mubr.f32.mxu0 %v324_v43  ;;  %p1253_p6 = scmp.ne.s32.totalorder %s681_s10, %s1252_s22  ;;  %p1258_p8 = scmp.lt.s32.totalorder %s1252_s22, %s1252_s22 }
 0x245   :  { %894 = vmatmul.mubr.f32.vlgmr.msra.gmra.mrb[0].mxu0 %v325_v44 }
 0x246   :  { %1062 = vmatpush1.bf16.msra.mxu0 %v1061_v55  ;;  %634 = vmatprep.mubr.f32.mxu0 %v1318_v39  ;;  %p1259_p9 = por %p1258_p8, %p1257_p7 }
 0x247   :  { %1064 = vmatprep.subr.bf16.mxu0 %v1063_v56 }
 0x248   :  { %p1260_p10 = pnand %p1259_p9, %p1253_p6 }
 0x24a   :  { %1066 = vmatpush1.bf16.msra.mxu0 %v1065_v61 }
 0x24b   :  { %1068 = vmatprep.subr.bf16.mxu0 %v1067_v62 }
 0x24e   :  { %1070 = vmatpush1.bf16.msra.mxu0 %v1069_v3 }
 0x24f   :  { %1072 = vmatprep.subr.bf16.mxu0 %v1071_v4 }
 0x252   :  { %1074 = vmatpush1.bf16.msra.mxu0 %v1073_v9 }
 0x253   :  { %1076 = vmatprep.subr.bf16.mxu0 %v1075_v10 }
 0x256   :  { %1078 = vmatpush1.bf16.msra.mxu0 %v1077_v15 }
 0x257   :  { %1080 = vmatprep.subr.bf16.mxu0 %v1079_v16 }
 0x25a   :  { %1082 = vmatpush1.bf16.msra.mxu0 %v1081_v21 }
 0x25b   :  { %1084 = vmatprep.subr.bf16.mxu0 %v1083_v22 }
 0x25e   :  { %1086 = vmatpush1.bf16.msra.mxu0 %v1085_v25 }
 0x25f   :  { %1088 = vmatprep.subr.bf16.mxu0 %v1087_v35 }
 0x262   :  { %1090 = vmatpush1.bf16.msra.mxu0 %v1089_v38 }
 0x318   :  { %v895_v27 = vpop.f32.mrb[0].mxu0 }
 0x319   :  { %v421_v28 = vadd.f32 %v895_v27, %v713_v26  ;;  %v415_v29 = vpop.f32.mrb[1].mxu0 }
 0x31a   :  { %v416_v30 = vadd.f32 %v713_v26, %v415_v29 }
 0x31b   :  { %v425_v32 = vmax.f32 %v421_v28, 0.0 }
 0x31c   :  { %v424_v31 = vmax.f32 %v416_v30, 0.0 }
 0x31e   :  { %928 = vmatprep.mubr.f32.mxu1 %v424_v31 }
 0x31f   :  { %929 = vmatmul.mubr.f32.vlgmr.msra.gmra.mrb[4].mxu1 %v425_v32 }
 0x3f2   :  { %v930_v41 = vpop.f32.mrb[4].mxu1 }
 0x3f3   :  { %v515_v42 = vpop.f32.mrb[5].mxu1  ;;  %v521_v44 = vadd.f32 %v930_v41, %v714_v40 }
 0x3f4   :  { %v516_v43 = vadd.f32 %v714_v40, %v515_v42 }
 0x3f5   :  { %v525_v46 = vmax.f32 %v521_v44, 0.0 }
 0x3f6   :  { %v524_v45 = vmax.f32 %v516_v43, 0.0 }
 0x3f8   :  { %635 = vmatmul.mubr.f32.vlgmr.msra.gmra.mrb[2].mxu0 %v524_v45 }
 0x3f9   :  { %640 = vmatprep.mubr.f32.mxu0 %v1318_v39 }
 0x3fc   :  { %641 = vmatmul.mubr.f32.gmra.mrb[4].mxu0 %v525_v46 }
 0x4cb   :  { %v636_v54 = vpop.f32.mrb[2].mxu0 }
 0x4cc   :  { %v637_v55 = vadd.f32 %v636_v54, %v563_v52  ;;  %v638_v56 = vpop.f32.mrb[3].mxu0 }
 0x4cd   :  { %v639_v57 = vadd.f32 %v638_v56, %v567_v53 }
 0x4ce   :  { %v715_v58 = vmul.f32 -1.442695, %v637_v55 }
 0x4cf   :  { %v716_v59 = vmul.f32 -1.442695, %v639_v57  ;;  %v642_v60 = vpop.f32.mrb[4].mxu0 }
 0x4d0   :  { %1104 = vpow2.f32 %v715_v58  ;;  %v643_v61 = vadd.f32 %v642_v60, %v563_v52  ;;  %v644_v62 = vpop.f32.mrb[5].mxu0 }
 0x4d1   :  { %1106 = vpow2.f32 %v716_v59  ;;  %v645_v63 = vadd.f32 %v644_v62, %v567_v53 }
 0x4d2   :  { %v717_v0 = vmul.f32 -1.442695, %v643_v61 }
 0x4d3   :  { %v718_v1 = vmul.f32 -1.442695, %v645_v63 }
 0x4d4   :  { %1108 = vpow2.f32 %v717_v0 }
 0x4d5   :  { %1110 = vpow2.f32 %v718_v1 }
 0x4da   :  { %v1105_v2 = vpop.eup %1104 }
 0x4db   :  { %v1107_v3 = vpop.eup %1106  ;;  %v659_v4 = vadd.f32 1.0, %v1105_v2 }
 0x4dc   :  { %v660_v5 = vadd.f32 1.0, %v1107_v3 }
 0x4dd   :  { %1112 = vrcp.f32 %v659_v4 }
 0x4de   :  { %v1109_v6 = vpop.eup %1108  ;;  %1114 = vrcp.f32 %v660_v5 }
 0x4df   :  { %v1111_v7 = vpop.eup %1110  ;;  %v661_v8 = vadd.f32 1.0, %v1109_v6 }
 0x4e0   :  { %v662_v9 = vadd.f32 1.0, %v1111_v7 }
 0x4e1   :  { %1116 = vrcp.f32 %v661_v8 }
 0x4e2   :  { %1118 = vrcp.f32 %v662_v9 }
 0x4e7   :  { %v1113_v10 = vpop.eup %1112 }
 0x4e8   :  { %v1115_v11 = vpop.eup %1114  ;;  %671 = vst [vmem:[#allocation13] sm:$0xff] %v1113_v10 }
 0x4e9   :  { %673 = vst [vmem:[#allocation14] sm:$0xff] %v1115_v11 }
 0x4eb   :  { %v1117_v12 = vpop.eup %1116 }
 0x4ec   :  { %v1119_v13 = vpop.eup %1118  ;;  %672 = vst [vmem:[#allocation13 + $0x8] sm:$0xff] %v1117_v12 }
 0x4ed   :  { %674 = vst [vmem:[#allocation14 + $0x8] sm:$0xff] %v1119_v13 }
 0x4ee   :  { %1263 = shalt.err (!%p1260_p10)
}
 0x4ef   :  { %s1264_s17 = scalar_lea.hbm %s1557_s11, 256 }
 0x4f0   :  { %p1265_p11 = scmp.ne.s32.totalorder %s1557_s11, %s1264_s17  ;;  %p1268_p12 = scmp.lt.u32.totalorder %s1264_s17, %s1557_s11 }
 0x4f2   :  { %p1270_p13 = pnand %p1268_p12, %p1265_p11 }
 0x4f4   :  { %1273 = shalt.err (!%p1270_p13)
}
 0x4f5   :  { %686 = dma.vmem_to_hbm [thread:$0]  %s681_s10, 256, %s1557_s11, [#allocation4], %s1310_s15, %s1310_s15, %s1311_s16  }
 0x4f6   :  { %s1274_s20 = scalar_lea.vmem %s1509_s14, 256  ;;  %p1279_p1 = scmp.lt.s32.totalorder %s1509_s14, %s1509_s14 }
 0x4f7   :  { %p1275_p0 = scmp.ne.s32.totalorder %s1509_s14, %s1274_s20  ;;  %p1280_p2 = scmp.lt.s32.totalorder %s1274_s20, %s1274_s20 }
 0x4f9   :  { %p1281_p3 = por %p1280_p2, %p1279_p1 }
 0x4fb   :  { %p1282_p4 = pnand %p1281_p3, %p1275_p0 }
 0x4fd   :  { %1285 = shalt.err (!%p1282_p4)
}
 0x4fe   :  { %s1286_s9 = scalar_lea.hbm %s1558_s12, 256 }
 0x4ff   :  { %p1287_p5 = scmp.ne.s32.totalorder %s1558_s12, %s1286_s9  ;;  %p1290_p6 = scmp.lt.u32.totalorder %s1286_s9, %s1558_s12 }
 0x501   :  { %p1292_p7 = pnand %p1290_p6, %p1287_p5 }
 0x503   :  { %1295 = shalt.err (!%p1292_p7)
}
 0x504   :  { %698 = dma.vmem_to_hbm [thread:$0]  %s1509_s14, 256, %s1558_s12, [#allocation15], %s1310_s15, %s1310_s15, %s1311_s16  }
 0x505   :  { %1304 = dma.done.wait [#allocation4], 256  }
 0x506   :  { %1305 = vsyncadd [#allocation4], 4294967040 }
 0x507   :  { %1306 = dma.done.wait [#allocation15], 256  }
 0x508   :  { %1307 = vsyncadd [#allocation15], 4294967040 }
 0x509   :  { %705 = vsyncpa [#allocation3], 1 }
 0x50a   :  { %706 = vsyncpa [#allocation6], 1 }
 0x50b   :  { %707 = vsyncpa [#allocation9], 1 }
 0x50c   :  { %708 = vsyncpa [#allocation12], 1 }
 0x50d   :  { %709 = vsyncpa [#allocation4], 1 }
 0x50e   :  { %710 = vsyncpa [#allocation15], 1 }

</bundles_post_ra>
